<compile_context>
chip_gen: v6e
topology: v6e:2x2x1
jax: 0.10.0
libtpu: 0.0.40
codegen_flags: <defaults>
</compile_context>

<pallas_src>
import jax
import jax.numpy as jnp
from jax.experimental import pallas as pl
from jax.experimental.pallas import tpu as pltpu

_LANE = 128
# Minimum sublane multiple per element size (f32 -> 8, bf16 -> 16, int8 -> 32).
_SUBLANE = {4: 8, 2: 16, 1: 32}
# ~8 MiB per block: in+out, double-buffered => ~32 MiB live VMEM.
_TARGET_BLOCK_BYTES = 8 * 1024 * 1024
_VMEM_LIMIT_BYTES = 40 * 1024 * 1024
# Above this size, force >= 2 row blocks so both v7x TCs get work.
_SPLIT_MIN_BYTES = 2 * 1024 * 1024


def _identity_kernel(x_ref, o_ref):
    # Straight pass-through of the current tile.
    o_ref[...] = x_ref[...]


def _block_rows(R, K, itemsize):
    """Rows per block: sublane-aligned, ~8 MiB, >=2 blocks for mid-size arrays."""
    sub = _SUBLANE.get(itemsize, 8)
    rows = max(sub, (_TARGET_BLOCK_BYTES // max(1, K * itemsize)) // sub * sub)
    if R * K * itemsize >= _SPLIT_MIN_BYTES and R > sub:
        # Cap at ~half the rows (sublane-rounded) so the 1-D "parallel" grid has
        # at least 2 steps and both TensorCores on v7x participate.
        half = -(-R // 2)
        half = -(-half // sub) * sub
        rows = min(rows, half)
    return R if rows >= R else rows


def _identity_2d(x2d: jax.Array) -> jax.Array:
    """Tiled identity copy over a 2-D view (lane-dense or full-extent last dim)."""
    R, K = x2d.shape
    itemsize = jnp.dtype(x2d.dtype).itemsize
    tr = _block_rows(R, K, itemsize)
    nbytes = R * K * itemsize

    return pl.pallas_call(
        _identity_kernel,
        out_shape=jax.ShapeDtypeStruct((R, K), x2d.dtype),
        grid_spec=pltpu.PrefetchScalarGridSpec(
            num_scalar_prefetch=0,
            grid=(pl.cdiv(R, tr),),
            in_specs=[pl.BlockSpec((tr, K), lambda i: (i, 0))],
            out_specs=pl.BlockSpec((tr, K), lambda i: (i, 0)),
        ),
        compiler_params=pltpu.CompilerParams(
            dimension_semantics=("parallel",),
            vmem_limit_bytes=_VMEM_LIMIT_BYTES,
        ),
        cost_estimate=pl.CostEstimate(
            flops=0, transcendentals=0, bytes_accessed=2 * nbytes
        ),
    )(x2d)


def identity_pallas(x: jax.Array) -> jax.Array:
    """Identity for an arbitrary-rank array, run through the Pallas kernel."""
    orig_shape = x.shape
    n = x.size
    if n == 0:
        return x

    if n % _LANE == 0:
        # Lane-dense hot path: no pad, no slice-back, no aliasing.
        K = _LANE
        for cand in (4096, 2048, 1024, 512, 256, 128):
            if n % cand == 0:
                K = cand
                break
    else:
        # Ragged path: keep the real trailing dim as a full-extent lane dim and
        # let Pallas mask the edge stores (no extra full-array HBM passes).
        K = orig_shape[-1] if x.ndim >= 2 else n

    y2d = _identity_2d(x.reshape(n // K, K))
    return y2d.reshape(orig_shape)


@jax.jit
def _identity_tuple(*xs):
    # Single dispatch for all inputs (one XLA program, one launch sequence).
    return tuple(identity_pallas(a) for a in xs)


def identity_forward(*inputs):
    """Mirror of Identity.forward: single arg -> array, multiple -> tuple."""
    outs = _identity_tuple(*inputs)
    if len(outs) == 1:
        return outs[0]
    return outs


if __name__ == "__main__":
    key = jax.random.PRNGKey(0)
    k1, k2, k3, k4 = jax.random.split(key, 4)

    # Single-input case (NCHW-like tensor).
    x = jax.random.normal(k1, (2, 4, 16, 16), dtype=jnp.float32)
    y = identity_forward(x)
    jax.block_until_ready(y)
    assert y.shape == x.shape and y.dtype == x.dtype
    assert jnp.array_equal(y, x)

    # Multi-input case: forward returns the tuple of inputs.
    x2 = jax.random.normal(k2, (8, 32), dtype=jnp.float32)
    outs = identity_forward(x, x2)
    jax.block_until_ready(outs)
    assert isinstance(outs, tuple) and len(outs) == 2
    assert jnp.array_equal(outs[0], x)
    assert jnp.array_equal(outs[1], x2)

    # Ragged (non-128-divisible) shape -> exercises the full-extent-lane path.
    x3 = jax.random.normal(k3, (3, 5, 7), dtype=jnp.float32)
    y3 = identity_forward(x3)
    jax.block_until_ready(y3)
    assert jnp.array_equal(y3, x3)

    # bf16 exercises the 16-row sublane packing rule.
    x4 = jax.random.normal(k4, (8, 256), dtype=jnp.bfloat16)
    y4 = identity_forward(x4)
    jax.block_until_ready(y4)
    assert y4.dtype == x4.dtype
    assert jnp.array_equal(y4, x4)

    # Moderately sized tensor exercises the multi-block (>=2 steps) row grid.
    x5 = jax.random.normal(k1, (2048, 1024), dtype=jnp.float32)
    y5 = identity_forward(x5)
    jax.block_until_ready(y5)
    assert jnp.array_equal(y5, x5)

    print("KERNEL_OK")
</pallas_src>

<mosaic_0001>
module attributes {stable_mosaic.version = 11 : i64} {
  func.func @_identity_kernel(%arg0: i32, %arg1: memref<1x2048xf32, #tpu.memory_space<vmem>>, %arg2: memref<1x2048xf32, #tpu.memory_space<vmem>>) attributes {dimension_semantics = [#tpu.dimension_semantics<parallel>], iteration_bounds = array<i64: 1>, scalar_prefetch = 0 : i64, scratch_operands = 0 : i64, tpu.core_type = #tpu.core_type<tc>, window_params = [{transform_indices = @transform_0, window_bounds = array<i64: 1, 2048>}, {transform_indices = @transform_1, window_bounds = array<i64: 1, 2048>}]} {
    %c0 = arith.constant 0 : index
    %c0_0 = arith.constant 0 : index
    %0 = vector.load %arg1[%c0, %c0_0] : memref<1x2048xf32, #tpu.memory_space<vmem>>, vector<1x2048xf32>
    %c0_1 = arith.constant 0 : index
    %c0_2 = arith.constant 0 : index
    %1 = vector.load %arg2[%c0_1, %c0_2] : memref<1x2048xf32, #tpu.memory_space<vmem>>, vector<1x2048xf32>
    tpu.vector_store %arg2[%c0_1, %c0_2], %0 {strides = array<i32>} : memref<1x2048xf32, #tpu.memory_space<vmem>>, vector<1x2048xf32>,
    return
  }
  func.func @transform_0(%arg0: i32) -> (i32, i32) {
    %c0_i32 = arith.constant 0 : i32
    %c0_i32_0 = arith.constant 0 : i32
    return %arg0, %c0_i32 : i32, i32
  }
  func.func @transform_1(%arg0: i32) -> (i32, i32) {
    %c0_i32 = arith.constant 0 : i32
    %c0_i32_0 = arith.constant 0 : i32
    return %arg0, %c0_i32 : i32, i32
  }
}

</mosaic_0001>

<bundles_post_ra>
// kernel: _identity_tuple.1
= control target key start
LH: loop header
LB: loop body
LE: loop exit
PB: predicated region body
PF: predicated region fallthrough
CT: control target
= control target key end

     0   :  { %s38_s0 = inlined_call_operand.vmem [shape: f32[1,2048], index: 0, kind: input, shape index: {}]   ;;  %s39_s1 = inlined_call_operand.vmem [shape: f32[1,2048], index: 1, kind: output, shape index: {}]  }
   0x1   :  { %v8_v0 = vld [vmem:[%s38_s0] sm:$0xff]  ;;  %v9_v1 = vld [vmem:[%s38_s0 + $0x8] sm:$0xff] }
   0x2   :  { %10 = vst [vmem:[%s39_s1] sm:$0xff] %v8_v0  ;;  %11 = vst [vmem:[%s39_s1 + $0x8] sm:$0xff] %v9_v1 }

</bundles_post_ra>
